<compile_context>
chip_gen: v5e
topology: v5e:2x2
jax: 0.10.0
libtpu: 0.0.40
codegen_flags: <defaults>
</compile_context>

<pallas_src>
import jax
import jax.numpy as jnp
from jax.experimental import pallas as pl
from jax.experimental.pallas import tpu as pltpu

_LANE = 128
_SUBLANE = 8


def mlp_kernel(x_ref, w1_ref, b1_ref, w2_ref, b2_ref, out_ref):
    """One batch tile of sigmoid(relu(x @ W1^T + b1) @ W2^T + b2).

    Computed in (feature, batch) orientation so the batch dimension sits on the
    128-wide lane axis: the MXU matmul has a dense lane N dimension and the final
    (1, TB) store is an unmasked, lane-dense vst.
    """
    # hidden^T = W1 @ x^T -> (H, TB); contraction over the shared last dim (In).
    # (Default MXU precision is fine for small In; bump to precision=HIGHEST if In grows.)
    ht = jax.lax.dot_general(
        w1_ref[...], x_ref[...],
        dimension_numbers=(((1,), (1,)), ((), ())),
        preferred_element_type=jnp.float32,
    )
    ht = jnp.maximum(ht + b1_ref[...], 0.0)                # b1: (H, 1) broadcast over lanes

    # Second layer (H -> 1): VPU multiply + cross-sublane reduce on the otherwise idle
    # XLU slot (an Hx1 MXU matmul would use <1% of the array).
    y = jnp.sum(ht * w2_ref[...], axis=0, keepdims=True)   # (1, TB)
    y = y + b2_ref[0, 0]                                   # scalar bias from SMEM
    out_ref[...] = jax.nn.sigmoid(y).astype(out_ref.dtype)


def _round_up(v, m):
    return -(-v // m) * m


def _vmem_limit_bytes():
    """Generation-aware scoped-VMEM limit: ~half of physical VMEM
    (v5e/v6e: 128 MiB -> 64 MiB, v7x: 64 MiB -> 32 MiB), conservative fallback."""
    phys = 64 * 1024 * 1024
    try:
        phys = int(pltpu.get_tpu_info().vmem_capacity_bytes)
    except Exception:
        pass
    return max(16 * 1024 * 1024, min(phys // 2, 64 * 1024 * 1024))


def _choose_batch_tile(B, In, H, vmem_limit, tb_hint=None):
    """Largest batch tile whose per-step VMEM footprint fits in ~70% of the scoped
    limit.  Large tiles matter here: per grid step there is ~0.35 us of pipeline
    overhead, so small tiles leave this memory-bound kernel overhead-bound."""
    in_pad = _round_up(In, _LANE)                       # x tile is lane-padded to 128
    h_pad = _round_up(max(H, _SUBLANE), _SUBLANE)
    # Per batch row: double-buffered lane-padded x row, ~3 live (H, tb) f32
    # intermediates, double-buffered 8-sublane-padded output row.
    per_row = (2 * in_pad + 3 * h_pad + 2 * _SUBLANE) * 4
    # Resident weights/biases (double-buffered worst case; b1/w2 pad to (h_pad, 128)).
    weight_bytes = 2 * (h_pad * in_pad + 2 * h_pad * _LANE) * 4
    budget = int(0.7 * vmem_limit) - weight_bytes
    tb = max(_LANE, (budget // per_row) // _LANE * _LANE)
    if tb_hint is not None:
        tb = min(tb, max(_SUBLANE, _round_up(int(tb_hint), _SUBLANE)))

    if tb >= B:
        # Whole batch fits in one tile.
        if B > 2 * _LANE:
            # Split so both TensorCores get a block on v7x ("parallel" batch axis).
            tb = _round_up((B + 1) // 2, _LANE)
        else:
            tb = B          # block == full array: no ragged read, no padding at all
    return tb


def _resident_spec(shape):
    """Constant-index-map spec for weights.  Once the weight tile reaches MiB scale,
    single-buffer it so its VMEM reservation is not doubled for a pipeline it never
    uses — that headroom converts directly into a larger batch tile."""
    nbytes = 4
    for d in shape:
        nbytes *= d
    if nbytes >= (1 << 20):
        return pl.BlockSpec(shape, lambda i: (0, 0), pipeline_mode=pl.Buffered(1))
    return pl.BlockSpec(shape, lambda i: (0, 0))


def neural_net1_forward(x, w1, b1, w2, b2, *, tb=None):
    """Fused Linear->ReLU->Linear->Sigmoid forward pass.

    x : (B, In) float32
    w1: (H, In) float32   (PyTorch nn.Linear weight layout)
    b1: (H,)    float32
    w2: (1, H)  float32
    b2: (1,)    float32
    returns (B, 1) float32
    """
    B, In = x.shape
    H = w1.shape[0]

    vmem_limit = _vmem_limit_bytes()
    tb = _choose_batch_tile(B, In, H, vmem_limit, tb_hint=tb)

    grid = (pl.cdiv(B, tb),)
    b_pad = grid[0] * tb      # output allocation padding is free; x is NOT copied/padded

    b1_col = b1.reshape(H, 1)   # broadcast over lanes inside the kernel
    w2_col = w2.reshape(H, 1)
    b2_s = b2.reshape(1, 1)     # scalar, lives in SMEM

    flops = 2 * B * In * H + 4 * B * H
    bytes_accessed = 4 * (B * In + In * H + 2 * H + 1 + B)

    out = pl.pallas_call(
        mlp_kernel,
        out_shape=jax.ShapeDtypeStruct((1, b_pad), jnp.float32),
        grid=grid,
        in_specs=[
            # x: batch-tiled and double-buffered.  The last (ragged) block is clipped
            # by Pallas; garbage lanes are sliced off below, so no jnp.pad copy of x.
            pl.BlockSpec((tb, In), lambda i: (i, 0)),
            _resident_spec((H, In)),                             # W1: VMEM-resident
            _resident_spec((H, 1)),                              # b1
            _resident_spec((H, 1)),                              # W2 column
            pl.BlockSpec(memory_space=pltpu.MemorySpace.SMEM),   # b2 scalar
        ],
        out_specs=pl.BlockSpec((1, tb), lambda i: (0, i)),       # lane-dense output
        compiler_params=pltpu.CompilerParams(
            dimension_semantics=("parallel",),   # batch axis -> both TCs on v7x
            vmem_limit_bytes=vmem_limit,
        ),
        cost_estimate=pl.CostEstimate(
            flops=flops, transcendentals=B, bytes_accessed=bytes_accessed,
        ),
    )(x, w1, b1_col, w2_col, b2_s)

    return out[0, :B].reshape(B, 1)


def init_params(key, input_size, hidden_size):
    """Deterministic PyTorch-style uniform(-1/sqrt(fan_in), 1/sqrt(fan_in)) init,
    in PyTorch nn.Linear weight layout."""
    k1, k2, k3, k4 = jax.random.split(key, 4)
    bound1 = 1.0 / (input_size ** 0.5)
    bound2 = 1.0 / (hidden_size ** 0.5)
    w1 = jax.random.uniform(k1, (hidden_size, input_size), jnp.float32, -bound1, bound1)
    b1 = jax.random.uniform(k2, (hidden_size,), jnp.float32, -bound1, bound1)
    w2 = jax.random.uniform(k3, (1, hidden_size), jnp.float32, -bound2, bound2)
    b2 = jax.random.uniform(k4, (1,), jnp.float32, -bound2, bound2)
    return w1, b1, w2, b2


def _reference(x, w1, b1, w2, b2):
    return jax.nn.sigmoid(jnp.maximum(x @ w1.T + b1, 0.0) @ w2.T + b2)


if __name__ == "__main__":
    input_size = 32
    hidden_size = 32

    key = jax.random.PRNGKey(0)
    kx, kp, kx2 = jax.random.split(key, 3)
    w1, b1, w2, b2 = init_params(kp, input_size, hidden_size)

    # Small batch: whole batch in a single exact tile (tb == B, no ragged read).
    batch = 8
    x = jax.random.normal(kx, (batch, input_size), dtype=jnp.float32)
    out = jax.block_until_ready(neural_net1_forward(x, w1, b1, w2, b2))
    ref = _reference(x, w1, b1, w2, b2)
    assert out.shape == (batch, 1)
    assert jnp.allclose(out, ref, atol=1e-5, rtol=1e-5)

    # Non-multiple batch: exercises the ragged last block (no jnp.pad of x) and the
    # >=2-step grid used to feed both TensorCores on v7x.
    batch2 = 300
    x2 = jax.random.normal(kx2, (batch2, input_size), dtype=jnp.float32)
    out2 = jax.block_until_ready(neural_net1_forward(x2, w1, b1, w2, b2))
    ref2 = _reference(x2, w1, b1, w2, b2)
    assert out2.shape == (batch2, 1)
    assert jnp.allclose(out2, ref2, atol=1e-5, rtol=1e-5)

    print("KERNEL_OK")
</pallas_src>

<mosaic_0001>
module attributes {stable_mosaic.version = 11 : i64} {
  func.func @mlp_kernel(%arg0: i32, %arg1: memref<8x32xf32, #tpu.memory_space<vmem>>, %arg2: memref<32x32xf32, #tpu.memory_space<vmem>>, %arg3: memref<32x1xf32, #tpu.memory_space<vmem>>, %arg4: memref<32x1xf32, #tpu.memory_space<vmem>>, %arg5: memref<1x1xf32, #tpu.memory_space<smem>>, %arg6: memref<1x8xf32, #tpu.memory_space<vmem>>) attributes {dimension_semantics = [#tpu.dimension_semantics<parallel>], iteration_bounds = array<i64: 1>, scalar_prefetch = 0 : i64, scratch_operands = 0 : i64, tpu.core_type = #tpu.core_type<tc>, window_params = [{transform_indices = @transform_0, window_bounds = array<i64: 8, 32>}, {pipeline_mode = #tpu.pipeline_mode<synchronous>, transform_indices = @transform_1, window_bounds = array<i64: 32, 32>}, {pipeline_mode = #tpu.pipeline_mode<synchronous>, transform_indices = @transform_2, window_bounds = array<i64: 32, 1>}, {pipeline_mode = #tpu.pipeline_mode<synchronous>, transform_indices = @transform_3, window_bounds = array<i64: 32, 1>}, {transform_indices = @transform_4, window_bounds = array<i64: 1, 1>}, {transform_indices = @transform_5, window_bounds = array<i64: 1, 8>}]} {
    %c0 = arith.constant 0 : index
    %c0_0 = arith.constant 0 : index
    %0 = vector.load %arg2[%c0, %c0_0] : memref<32x32xf32, #tpu.memory_space<vmem>>, vector<32x32xf32>
    %c0_1 = arith.constant 0 : index
    %c0_2 = arith.constant 0 : index
    %1 = vector.load %arg1[%c0_1, %c0_2] : memref<8x32xf32, #tpu.memory_space<vmem>>, vector<8x32xf32>
    %cst = arith.constant dense<0.000000e+00> : vector<32x8xf32>
    %2 = tpu.matmul %0, %1, %cst {dimension_numbers = #tpu.dot_dimension_numbers<[1], [1], [0], [0], [0, 0, 1, 0], [], []>} : vector<32x32xf32>, vector<8x32xf32>, vector<32x8xf32> -> vector<32x8xf32>
    %c0_3 = arith.constant 0 : index
    %c0_4 = arith.constant 0 : index
    %3 = vector.load %arg3[%c0_3, %c0_4] : memref<32x1xf32, #tpu.memory_space<vmem>>, vector<32x1xf32>
    %4 = vector.broadcast %3 : vector<32x1xf32> to vector<32x8xf32>
    %5 = arith.addf %2, %4 : vector<32x8xf32>
    %cst_5 = arith.constant 0.000000e+00 : f32
    %6 = vector.broadcast %cst_5 : f32 to vector<32x8xf32>
    %7 = arith.maximumf %5, %6 : vector<32x8xf32>
    %c0_6 = arith.constant 0 : index
    %c0_7 = arith.constant 0 : index
    %8 = vector.load %arg4[%c0_6, %c0_7] : memref<32x1xf32, #tpu.memory_space<vmem>>, vector<32x1xf32>
    %9 = vector.broadcast %8 : vector<32x1xf32> to vector<32x8xf32>
    %10 = arith.mulf %7, %9 : vector<32x8xf32>
    %cst_8 = arith.constant dense<0.000000e+00> : vector<8xf32>
    %11 = vector.multi_reduction <add>, %10, %cst_8 [0] : vector<32x8xf32> to vector<8xf32>
    %12 = vector.shape_cast %11 : vector<8xf32> to vector<1x8xf32>
    %c0_9 = arith.constant 0 : index
    %c0_10 = arith.constant 0 : index
    %13 = memref.load %arg5[%c0_9, %c0_10] : memref<1x1xf32, #tpu.memory_space<smem>>
    %14 = vector.broadcast %13 : f32 to vector<1x8xf32>
    %15 = arith.addf %12, %14 : vector<1x8xf32>
    %16 = arith.negf %15 : vector<1x8xf32>
    %17 = math.exp %16 : vector<1x8xf32>
    %cst_11 = arith.constant 1.000000e+00 : f32
    %18 = vector.broadcast %cst_11 : f32 to vector<1x8xf32>
    %19 = arith.addf %18, %17 : vector<1x8xf32>
    %20 = arith.divf %18, %19 : vector<1x8xf32>
    %c0_12 = arith.constant 0 : index
    %c0_13 = arith.constant 0 : index
    %21 = vector.load %arg6[%c0_12, %c0_13] : memref<1x8xf32, #tpu.memory_space<vmem>>, vector<1x8xf32>
    tpu.vector_store %arg6[%c0_12, %c0_13], %20 {strides = array<i32>} : memref<1x8xf32, #tpu.memory_space<vmem>>, vector<1x8xf32>,
    return
  }
  func.func @transform_0(%arg0: i32) -> (i32, i32) {
    %c0_i32 = arith.constant 0 : i32
    %c0_i32_0 = arith.constant 0 : i32
    return %arg0, %c0_i32 : i32, i32
  }
  func.func @transform_1(%arg0: i32) -> (i32, i32) {
    %c0_i32 = arith.constant 0 : i32
    %c0_i32_0 = arith.constant 0 : i32
    %c0_i32_1 = arith.constant 0 : i32
    return %c0_i32, %c0_i32_0 : i32, i32
  }
  func.func @transform_2(%arg0: i32) -> (i32, i32) {
    %c0_i32 = arith.constant 0 : i32
    %c0_i32_0 = arith.constant 0 : i32
    %c0_i32_1 = arith.constant 0 : i32
    return %c0_i32, %c0_i32_0 : i32, i32
  }
  func.func @transform_3(%arg0: i32) -> (i32, i32) {
    %c0_i32 = arith.constant 0 : i32
    %c0_i32_0 = arith.constant 0 : i32
    %c0_i32_1 = arith.constant 0 : i32
    return %c0_i32, %c0_i32_0 : i32, i32
  }
  func.func @transform_4(%arg0: i32) -> (i32, i32) {
    %c0_i32 = arith.constant 0 : i32
    %c0_i32_0 = arith.constant 0 : i32
    %c0_i32_1 = arith.constant 0 : i32
    return %c0_i32, %c0_i32_0 : i32, i32
  }
  func.func @transform_5(%arg0: i32) -> (i32, i32) {
    %c0_i32 = arith.constant 0 : i32
    %c0_i32_0 = arith.constant 0 : i32
    return %c0_i32, %arg0 : i32, i32
  }
}

</mosaic_0001>

<bundles_post_ra>
// kernel: tpu_custom_call.1
= control target key start
LH: loop header
LB: loop body
LE: loop exit
PB: predicated region body
PF: predicated region fallthrough
CT: control target
= control target key end

     0   :  { %vm51_vm0 = vcmask 261120   ;;  %v226_v1 = vmov 0   ;;  %s315_s0 = inlined_call_operand.vmem [shape: f32[8,32], index: 0, kind: input, shape index: {}]   ;;  %s316_s1 = inlined_call_operand.vmem [shape: f32[32,32], index: 1, kind: input, shape index: {}]   ;;  %s317_s2 = inlined_call_operand.vmem [shape: f32[32,1], index: 2, kind: input, shape index: {}]   ;;  %s318_s3 = inlined_call_operand.vmem [shape: f32[32,1], index: 3, kind: input, shape index: {}]   ;;  %s319_s4 = inlined_call_operand.<no memory space> [shape: f32[1,1], index: 4, kind: input, shape index: {}]   ;;  %s320_s5 = inlined_call_operand.hbm [shape: f32[1,8], index: 5, kind: output, shape index: {}]  }
   0x1   :  { %v26_v0 = vld [vmem:[%s315_s0] sm:$0xff]  ;;  %194 = vset.pattern.permute.xlu1 %v226_v1  ;;  %193 = vset.pattern.permute.xlu0 %v226_v1  ;;  %v29_v2 = vld [vmem:[%s317_s2 + $0x10] sm:$0xff]  ;;  %v23_v5 = vld [vmem:[%s316_s1 + $0x8] sm:$0xff] }
   0x2   :  { %v27_v3 = vld [vmem:[%s317_s2] sm:$0xff]  ;;  %182 = vmatpush.xpose.msk.msra.mxu0 %vm51_vm0, %v26_v0  ;;  %188 = vmatpush.xpose.msk.msra.mxu1 %vm51_vm0, %v26_v0  ;;  %v24_v6 = vld [vmem:[%s316_s1 + $0x10] sm:$0xff]  ;;  %v25_v7 = vld [vmem:[%s316_s1 + $0x18] sm:$0xff] }
   0x3   :  { %v22_v4 = vld [vmem:[%s316_s1] sm:$0xff]  ;;  %189 = vmatpush.xpose.msk.msra.mxu2 %vm51_vm0, %v26_v0  ;;  %190 = vmatpush.xpose.msk.msra.mxu3 %vm51_vm0, %v26_v0 }
   0x4   :  { %43 = vperm.xlu1 %194, %v29_v2   ;;  %33 = vperm.xlu0 %193, %v27_v3  }
   0x5   :  { %11 = vsyncpa [#allocation4], 0  ;;  %183 = vmatmul.msk.f32.vlgmr.msra.gmra.mxu0 %vm51_vm0, %v22_v4  ;;  %184 = vmatmul.msk.f32.vlgmr.msra.gmra.mxu1 %vm51_vm0, %v23_v5  ;;  %v100_v8 = vld [vmem:[%s318_s3] sm:$0xff]  ;;  %v30_v9 = vld [vmem:[%s317_s2 + $0x18] sm:$0xff]  ;;  %vm128_vm1 = vcmask 64512   ;;  %v143_v50 = vstv %s319_s4  ;;  %s227_s17 = smov [#allocation3]  }
   0x6   :  { %185 = vmatmul.msk.f32.vlgmr.msra.gmra.mxu2 %vm51_vm0, %v24_v6  ;;  %186 = vmatmul.msk.f32.vlgmr.msra.gmra.mxu3 %vm51_vm0, %v25_v7  ;;  %v28_v10 = vld [vmem:[%s317_s2 + $0x8] sm:$0xff]  ;;  %v103_v12 = vld [vmem:[%s318_s3 + $0x18] sm:$0xff]  ;;  %v102_v13 = vld [vmem:[%s318_s3 + $0x10] sm:$0xff]  ;;  %s171_s18 = sshll.u32 %s227_s17, 4  ;;  %s173_s4 = sshll.u32 %s320_s5, 4  ;;  %vm164_vm5 = vcmask 57344   ;;  %s172_s18 = int_to_ptr.vmem [resolvable:$true] %s171_s18  ;;  %s174_s4 = int_to_ptr.hbm [resolvable:$true] %s173_s4 }
   0x7   :  { %195 = vset.pattern.permute.xlu2 %v226_v1  ;;  %v101_v11 = vld [vmem:[%s318_s3 + $0x8] sm:$0xff] }
   0x8   :  { %106 = vperm.xlu2 %195, %v100_v8  }
   0xc   :  { %48 = vperm.xlu1 %194, %v30_v9   ;;  %38 = vperm.xlu0 %193, %v28_v10  }
  0x10   :  { %111 = vperm.xlu2 %195, %v101_v11  }
  0x14   :  { %121 = vperm.xlu1 %194, %v103_v12   ;;  %116 = vperm.xlu0 %193, %v102_v13  }
  0x62   :  { %v107_v16 = vpop.permute.xlu2 %106 }
  0x6a   :  { %v112_v25 = vpop.permute.xlu2 %111 }
  0x76   :  { %v34_v14 = vpop.permute.xlu0 %33  ;;  %v44_v15 = vpop.permute.xlu1 %43 }
  0x7e   :  { %v39_v17 = vpop.permute.xlu0 %38  ;;  %v49_v20 = vpop.permute.xlu1 %48 }
  0x82   :  { %v84_v18 = vpop.f32.mrf.mxu0  ;;  %v87_v19 = vpop.f32.mrf.mxu1 }
  0x83   :  { %v85_v21 = vadd.f32 %v84_v18, %v34_v14  ;;  %v88_v22 = vadd.f32 %v87_v19, %v39_v17 }
  0x85   :  { %v96_v23 = vmax.f32 %v85_v21, 0.0  ;;  %v97_v24 = vmax.f32 %v88_v22, 0.0 }
  0x86   :  { %v122_v36 = vpop.permute.xlu1 %121  ;;  %v117_v37 = vpop.permute.xlu0 %116 }
  0x87   :  { %v124_v26 = vmul.f32 %v107_v16, %v96_v23  ;;  %v125_v27 = vmul.f32 %v112_v25, %v97_v24 }
  0x89   :  { %v90_v28 = vpop.f32.mrf.mxu2  ;;  %v93_v29 = vpop.f32.mrf.mxu3  ;;  %v129_v32 = vsel %vm128_vm1, %v124_v26, 0.0  ;;  %v130_v33 = vsel %vm128_vm1, %v125_v27, 0.0 }
  0x8a   :  { %v91_v30 = vadd.f32 %v90_v28, %v44_v15  ;;  %v94_v31 = vadd.f32 %v93_v29, %v49_v20  ;;  %v131_v40 = vadd.f32 %v130_v33, %v129_v32 }
  0x8c   :  { %v98_v34 = vmax.f32 %v91_v30, 0.0  ;;  %v99_v35 = vmax.f32 %v94_v31, 0.0 }
  0x8e   :  { %v126_v38 = vmul.f32 %v117_v37, %v98_v34  ;;  %v127_v39 = vmul.f32 %v122_v36, %v99_v35 }
  0x90   :  { %v132_v41 = vsel %vm128_vm1, %v126_v38, 0.0  ;;  %v134_v43 = vsel %vm128_vm1, %v127_v39, 0.0 }
  0x91   :  { %v133_v42 = vadd.f32 %v132_v41, %v131_v40 }
  0x93   :  { %v135_v44 = vadd.f32 %v134_v43, %v133_v42 }
  0x95   :  { %v136_v45 = vrot.slane %v135_v44, 4 }
  0x97   :  { %v137_v46 = vadd.f32 %v136_v45, %v135_v44 }
  0x99   :  { %v138_v47 = vrot.slane %v137_v46, 2 }
  0x9b   :  { %v139_v48 = vadd.f32 %v138_v47, %v137_v46 }
  0x9d   :  { %v140_v49 = vrot.slane %v139_v48, 1 }
  0x9f   :  { %v141_v51 = vadd.f32 %v140_v49, %v139_v48 }
  0xa1   :  { %v144_v52 = vadd.f32 %v143_v50, %v141_v51 }
  0xa3   :  { %v187_v53 = vmul.f32 -1.442695, %v144_v52 }
  0xa5   :  { %196 = vpow2.f32 %v187_v53 }
  0xab   :  { %v197_v54 = vpop.eup %196 }
  0xac   :  { %v148_v55 = vadd.f32 1.0, %v197_v54 }
  0xae   :  { %198 = vrcp.f32 %v148_v55  ;;  %v160_v59 = vand.u32 2147483648, %v148_v55  ;;  %v158_v61 = vand.u32 2147483647, %v148_v55  ;;  %vm154_vm3 = vweird.f32 %v148_v55 }
  0xb0   :  { %v161_v63 = vor.u32 1.1754944e-38, %v160_v59  ;;  %vm159_vm6 = vcmp.eq.f32.partialorder %v158_v61, 8.507059e+37 }
  0xb4   :  { %v199_v56 = vpop.eup %198 }
  0xb5   :  { %v150_v57 = vmul.f32 %v199_v56, %v148_v55  ;;  %vm155_vm2 = vweird.f32 %v199_v56 }
  0xb6   :  { %vm156_vm4 = vmor %vm154_vm3, %vm155_vm2 }
  0xb7   :  { %v151_v58 = vsub.f32 1.0, %v150_v57 }
  0xb9   :  { %v152_v60 = vmul.f32 %v199_v56, %v151_v58 }
  0xbb   :  { %v153_v62 = vadd.f32 %v199_v56, %v152_v60 }
  0xbd   :  { %v157_v0 = vsel %vm156_vm4, %v199_v56, %v153_v62 }
  0xbe   :  { %v162_v1 = vsel %vm159_vm6, %v161_v63, %v157_v0 }
  0xbf   :  { %165 = vst.msk [vmem:[#allocation3] sm:$0x1] %vm164_vm5, %v162_v1 }
  0xc0   :  { %176 = dma.vmem_to_hbm [thread:$0]  %s172_s18, 16, %s174_s4, [#allocation4]  }
  0xc1   :  { %224 = dma.done.wait [#allocation4], 16  }
  0xc2   :  { %225 = vsyncadd [#allocation4], 4294967280 }
  0xc3   :  { %181 = vsyncpa [#allocation4], 1 }

</bundles_post_ra>
